<compile_context>
chip_gen: v7x
topology: tpu7x:2x2x1
jax: 0.10.0
libtpu: 0.0.40
codegen_flags: <defaults>
</compile_context>

<pallas_src>
import functools
import math

import jax
import jax.numpy as jnp
from jax.experimental import pallas as pl
from jax.experimental.pallas import tpu as pltpu

MAX_LOGVAR = 4.0
MIN_LOGVAR = -40.0
_HALF_LOG_2PI = 0.5 * math.log(2.0 * math.pi)


def _softplus(x):
    # numerically stable softplus
    return jnp.logaddexp(x, 0.0)


def _round_up(x, m):
    return ((x + m - 1) // m) * m


def policy_kernel(x_ref, eps_ref, w1_ref, w2_ref, w3m_ref, w3v_ref,
                  b1_ref, b2_ref, b3m_ref, b3v_ref, out_ref, *, act_dim):
    # Everything is batch-in-lanes: (features, tile_b).
    x = x_ref[...]                                            # (obs_dim, TB)
    eps = eps_ref[...]                                        # (act_dim, TB)

    h1 = jnp.maximum(
        jnp.dot(w1_ref[...], x, preferred_element_type=jnp.float32)
        + b1_ref[...], 0.0)                                   # (H, TB)
    h2 = jnp.maximum(
        jnp.dot(w2_ref[...], h1, preferred_element_type=jnp.float32)
        + b2_ref[...], 0.0)                                   # (H, TB)

    mean = (jnp.dot(w3m_ref[...], h2, preferred_element_type=jnp.float32)
            + b3m_ref[...])                                   # (act_dim, TB)
    logvar = (jnp.dot(w3v_ref[...], h2, preferred_element_type=jnp.float32)
              + b3v_ref[...])                                 # (act_dim, TB)

    # PETS-style soft clamp of logvar into (MIN_LOGVAR, MAX_LOGVAR).
    logvar = MAX_LOGVAR - _softplus(MAX_LOGVAR - logvar)
    logvar = MIN_LOGVAR + _softplus(logvar - MIN_LOGVAR)

    half_logvar = 0.5 * logvar
    std = jnp.exp(half_logvar)                                # only for rsample

    # act = Normal(mean, std).rsample() with externally supplied eps.
    act = mean + std * eps                                    # (act_dim, TB)

    # z = (act - mean)/std == eps and log(std) == 0.5*logvar, so one reduction
    # over half_logvar feeds both log_prob and entropy.
    s = jnp.sum(half_logvar, axis=0, keepdims=True)           # (1, TB)
    sq = jnp.sum(eps * eps, axis=0, keepdims=True)            # (1, TB)
    logp = -0.5 * sq - s - act_dim * _HALF_LOG_2PI            # (1, TB)
    ent = act_dim * (0.5 + _HALF_LOG_2PI) + s                 # (1, TB)

    # Packed output rows [act | logp | ent].  In this layout every store is
    # lane-dense (tile_b lanes); only the (cheap) sublane extent is narrow.
    out_ref[0:act_dim, :] = act
    out_ref[act_dim:act_dim + 1, :] = logp
    out_ref[act_dim + 1:act_dim + 2, :] = ent


def mlp_policy_forward(obs, eps, params, *, tile_b=None):
    """Stochastic forward pass. Returns (act, log_prob, entropy)."""
    B, obs_dim = obs.shape
    act_dim = eps.shape[1]
    hidden_dim = params["w1t"].shape[0]
    out_dim = act_dim + 2

    # ---- batch tiling: 128-aligned lane tiles, >= 2 grid steps when possible
    # (so v7x megacore shards the "parallel" axis across both TensorCores). ----
    b128 = _round_up(max(B, 1), 128)
    if tile_b is None:
        tile_b = min(1024, b128)
        if b128 > 128 and b128 // tile_b < 2:
            tile_b = _round_up(b128 // 2, 128)
    tile_b = max(128, _round_up(tile_b, 128))
    Bp = _round_up(B, tile_b)
    grid = (Bp // tile_b,)

    # Batch-in-lanes streamed operands: (features, Bp).  This is one tiny
    # (B x (obs_dim+act_dim)) transpose/pad in the wrapper; in exchange every
    # in-kernel load/store is lane-dense.  Pad values are finite (0).
    obs_t = jnp.transpose(obs.astype(jnp.float32))
    eps_t = jnp.transpose(eps.astype(jnp.float32))
    if Bp != B:
        obs_t = jnp.pad(obs_t, ((0, 0), (0, Bp - B)))
        eps_t = jnp.pad(eps_t, ((0, 0), (0, Bp - B)))

    kernel = functools.partial(policy_kernel, act_dim=act_dim)

    stream = lambda i: (0, i)   # streamed along the batch/lane axis
    inv = lambda i: (0, 0)      # grid-invariant (weights stay resident in VMEM)

    # VMEM budget: double-buffered streamed blocks + live activations + resident
    # weights (lane-padded), with headroom.  Kept inside v7x's 64 MiB physical
    # and raised above v5e's 16 MiB default scoped limit only if needed.
    pad8 = lambda n: _round_up(n, 8)
    est = 4 * (
        2 * tile_b * (pad8(obs_dim) + pad8(act_dim) + pad8(out_dim))      # in/out x2 buffers
        + 3 * tile_b * pad8(hidden_dim)                                   # h1/h2/head live
        + pad8(hidden_dim) * (_round_up(obs_dim, 128) + _round_up(hidden_dim, 128))
        + 2 * pad8(act_dim) * _round_up(hidden_dim, 128)                  # head weights
        + 4 * pad8(hidden_dim) * 128                                      # biases (padded)
    )
    vmem_limit = int(min(32 * 1024 * 1024, max(16 * 1024 * 1024, 2 * est)))

    flops = 2 * Bp * hidden_dim * (obs_dim + hidden_dim + 2 * act_dim)
    bytes_accessed = 4 * (Bp * (obs_dim + act_dim + out_dim)
                          + hidden_dim * (obs_dim + hidden_dim + 2 * act_dim)
                          + 2 * hidden_dim + 2 * act_dim)
    cost = pl.CostEstimate(flops=flops,
                           transcendentals=5 * Bp * act_dim,
                           bytes_accessed=bytes_accessed)

    out_t = pl.pallas_call(
        kernel,
        out_shape=jax.ShapeDtypeStruct((out_dim, Bp), jnp.float32),
        grid=grid,
        in_specs=[
            pl.BlockSpec((obs_dim, tile_b), stream),
            pl.BlockSpec((act_dim, tile_b), stream),
            # TODO(synk): for large hidden_dim on v6e/v7x, store these weights
            # in bf16 (keep preferred_element_type=f32) and/or use
            # pipeline_mode=pl.Buffered(1) to halve their VMEM footprint.
            pl.BlockSpec((hidden_dim, obs_dim), inv),
            pl.BlockSpec((hidden_dim, hidden_dim), inv),
            pl.BlockSpec((act_dim, hidden_dim), inv),
            pl.BlockSpec((act_dim, hidden_dim), inv),
            pl.BlockSpec((hidden_dim, 1), inv),
            pl.BlockSpec((hidden_dim, 1), inv),
            pl.BlockSpec((act_dim, 1), inv),
            pl.BlockSpec((act_dim, 1), inv),
        ],
        out_specs=pl.BlockSpec((out_dim, tile_b), stream),
        compiler_params=pltpu.CompilerParams(
            dimension_semantics=("parallel",),
            vmem_limit_bytes=vmem_limit),
        cost_estimate=cost,
    )(obs_t, eps_t,
      params["w1t"], params["w2t"], params["w3mt"], params["w3vt"],
      params["b1"], params["b2"], params["b3m"], params["b3v"])

    out_t = out_t[:, :B]
    act = jnp.transpose(out_t[:act_dim, :])
    logp = jnp.transpose(out_t[act_dim:act_dim + 1, :])
    ent = jnp.transpose(out_t[act_dim + 1:act_dim + 2, :])
    return act, logp, ent


def init_params(key, obs_dim, hidden_dim, act_dim):
    """PyTorch-Linear-style init U(-1/sqrt(fan_in), 1/sqrt(fan_in)).

    Weights are stored pre-transposed once, as (fan_out, fan_in), and biases as
    (fan_out, 1) columns, matching the kernel's batch-in-lanes layout.
    """
    def linear_t(k, fan_in, fan_out):
        kw, kb = jax.random.split(k)
        bound = 1.0 / math.sqrt(fan_in)
        w_t = jax.random.uniform(kw, (fan_out, fan_in), jnp.float32, -bound, bound)
        b = jax.random.uniform(kb, (fan_out, 1), jnp.float32, -bound, bound)
        return w_t, b

    k1, k2, k3, k4 = jax.random.split(key, 4)
    w1t, b1 = linear_t(k1, obs_dim, hidden_dim)
    w2t, b2 = linear_t(k2, hidden_dim, hidden_dim)
    w3mt, b3m = linear_t(k3, hidden_dim, act_dim)   # mean head
    w3vt, b3v = linear_t(k4, hidden_dim, act_dim)   # logvar head
    return dict(w1t=w1t, b1=b1, w2t=w2t, b2=b2,
                w3mt=w3mt, b3m=b3m, w3vt=w3vt, b3v=b3v)


def reference_forward(obs, eps, params):
    """Pure-JAX reference (original, unsimplified formulation)."""
    h1 = jnp.maximum(obs @ params["w1t"].T + params["b1"].T, 0.0)
    h2 = jnp.maximum(h1 @ params["w2t"].T + params["b2"].T, 0.0)
    mean = h2 @ params["w3mt"].T + params["b3m"].T
    logvar = h2 @ params["w3vt"].T + params["b3v"].T
    logvar = MAX_LOGVAR - jax.nn.softplus(MAX_LOGVAR - logvar)
    logvar = MIN_LOGVAR + jax.nn.softplus(logvar - MIN_LOGVAR)
    std = jnp.exp(0.5 * logvar)
    act = mean + std * eps
    z = (act - mean) / std
    logp = jnp.sum(-0.5 * z * z - jnp.log(std) - _HALF_LOG_2PI, -1, keepdims=True)
    ent = jnp.sum(0.5 + _HALF_LOG_2PI + jnp.log(std), -1, keepdims=True)
    return act, logp, ent


if __name__ == "__main__":
    # Small shapes consistent with the module: obs_shape=(4,), act_shape=(2,),
    # hidden_dim=32, batch=8.
    obs_shape = (4,)
    act_shape = (2,)
    hidden_dim = 32
    batch = 8
    obs_dim = int(math.prod(obs_shape))
    act_dim = int(math.prod(act_shape))

    key = jax.random.PRNGKey(0)
    k_param, k_obs, k_eps = jax.random.split(key, 3)

    params = init_params(k_param, obs_dim, hidden_dim, act_dim)
    obs = jax.random.normal(k_obs, (batch, obs_dim), jnp.float32)
    eps = jax.random.normal(k_eps, (batch, act_dim), jnp.float32)

    act, logp, ent = mlp_policy_forward(obs, eps, params)
    jax.block_until_ready((act, logp, ent))

    # correctness check against pure-JAX reference
    ract, rlogp, rent = reference_forward(obs, eps, params)
    assert jnp.allclose(act, ract, atol=1e-5, rtol=1e-5)
    assert jnp.allclose(logp, rlogp, atol=1e-5, rtol=1e-5)
    assert jnp.allclose(ent, rent, atol=1e-5, rtol=1e-5)

    print("KERNEL_OK")
</pallas_src>

<mosaic_0001>
module attributes {stable_mosaic.version = 11 : i64} {
  func.func @policy_kernel(%arg0: i32, %arg1: memref<4x128xf32, #tpu.memory_space<vmem>>, %arg2: memref<2x128xf32, #tpu.memory_space<vmem>>, %arg3: memref<32x4xf32, #tpu.memory_space<vmem>>, %arg4: memref<32x32xf32, #tpu.memory_space<vmem>>, %arg5: memref<2x32xf32, #tpu.memory_space<vmem>>, %arg6: memref<2x32xf32, #tpu.memory_space<vmem>>, %arg7: memref<32x1xf32, #tpu.memory_space<vmem>>, %arg8: memref<32x1xf32, #tpu.memory_space<vmem>>, %arg9: memref<2x1xf32, #tpu.memory_space<vmem>>, %arg10: memref<2x1xf32, #tpu.memory_space<vmem>>, %arg11: memref<4x128xf32, #tpu.memory_space<vmem>>) attributes {dimension_semantics = [#tpu.dimension_semantics<parallel>], iteration_bounds = array<i64: 1>, scalar_prefetch = 0 : i64, scratch_operands = 0 : i64, tpu.core_type = #tpu.core_type<tc>, window_params = [{transform_indices = @transform_0, window_bounds = array<i64: 4, 128>}, {transform_indices = @transform_1, window_bounds = array<i64: 2, 128>}, {pipeline_mode = #tpu.pipeline_mode<synchronous>, transform_indices = @transform_2, window_bounds = array<i64: 32, 4>}, {pipeline_mode = #tpu.pipeline_mode<synchronous>, transform_indices = @transform_3, window_bounds = array<i64: 32, 32>}, {pipeline_mode = #tpu.pipeline_mode<synchronous>, transform_indices = @transform_4, window_bounds = array<i64: 2, 32>}, {pipeline_mode = #tpu.pipeline_mode<synchronous>, transform_indices = @transform_5, window_bounds = array<i64: 2, 32>}, {pipeline_mode = #tpu.pipeline_mode<synchronous>, transform_indices = @transform_6, window_bounds = array<i64: 32, 1>}, {pipeline_mode = #tpu.pipeline_mode<synchronous>, transform_indices = @transform_7, window_bounds = array<i64: 32, 1>}, {pipeline_mode = #tpu.pipeline_mode<synchronous>, transform_indices = @transform_8, window_bounds = array<i64: 2, 1>}, {pipeline_mode = #tpu.pipeline_mode<synchronous>, transform_indices = @transform_9, window_bounds = array<i64: 2, 1>}, {transform_indices = @transform_10, window_bounds = array<i64: 4, 128>}]} {
    %c0 = arith.constant 0 : index
    %c0_0 = arith.constant 0 : index
    %0 = vector.load %arg1[%c0, %c0_0] : memref<4x128xf32, #tpu.memory_space<vmem>>, vector<4x128xf32>
    %c0_1 = arith.constant 0 : index
    %c0_2 = arith.constant 0 : index
    %1 = vector.load %arg2[%c0_1, %c0_2] : memref<2x128xf32, #tpu.memory_space<vmem>>, vector<2x128xf32>
    %c0_3 = arith.constant 0 : index
    %c0_4 = arith.constant 0 : index
    %2 = vector.load %arg3[%c0_3, %c0_4] : memref<32x4xf32, #tpu.memory_space<vmem>>, vector<32x4xf32>
    %cst = arith.constant dense<0.000000e+00> : vector<32x128xf32>
    %3 = tpu.matmul %2, %0, %cst {dimension_numbers = #tpu.dot_dimension_numbers<[1], [0], [0], [1], [0, 0, 1, 1], [], []>} : vector<32x4xf32>, vector<4x128xf32>, vector<32x128xf32> -> vector<32x128xf32>
    %c0_5 = arith.constant 0 : index
    %c0_6 = arith.constant 0 : index
    %4 = vector.load %arg7[%c0_5, %c0_6] : memref<32x1xf32, #tpu.memory_space<vmem>>, vector<32x1xf32>
    %5 = vector.broadcast %4 : vector<32x1xf32> to vector<32x128xf32>
    %6 = arith.addf %3, %5 : vector<32x128xf32>
    %cst_7 = arith.constant 0.000000e+00 : f32
    %7 = vector.broadcast %cst_7 : f32 to vector<32x128xf32>
    %8 = arith.maximumf %6, %7 : vector<32x128xf32>
    %c0_8 = arith.constant 0 : index
    %c0_9 = arith.constant 0 : index
    %9 = vector.load %arg4[%c0_8, %c0_9] : memref<32x32xf32, #tpu.memory_space<vmem>>, vector<32x32xf32>
    %cst_10 = arith.constant dense<0.000000e+00> : vector<32x128xf32>
    %10 = tpu.matmul %9, %8, %cst_10 {dimension_numbers = #tpu.dot_dimension_numbers<[1], [0], [0], [1], [0, 0, 1, 1], [], []>} : vector<32x32xf32>, vector<32x128xf32>, vector<32x128xf32> -> vector<32x128xf32>
    %c0_11 = arith.constant 0 : index
    %c0_12 = arith.constant 0 : index
    %11 = vector.load %arg8[%c0_11, %c0_12] : memref<32x1xf32, #tpu.memory_space<vmem>>, vector<32x1xf32>
    %12 = vector.broadcast %11 : vector<32x1xf32> to vector<32x128xf32>
    %13 = arith.addf %10, %12 : vector<32x128xf32>
    %cst_13 = arith.constant 0.000000e+00 : f32
    %14 = vector.broadcast %cst_13 : f32 to vector<32x128xf32>
    %15 = arith.maximumf %13, %14 : vector<32x128xf32>
    %c0_14 = arith.constant 0 : index
    %c0_15 = arith.constant 0 : index
    %16 = vector.load %arg5[%c0_14, %c0_15] : memref<2x32xf32, #tpu.memory_space<vmem>>, vector<2x32xf32>
    %cst_16 = arith.constant dense<0.000000e+00> : vector<2x128xf32>
    %17 = tpu.matmul %16, %15, %cst_16 {dimension_numbers = #tpu.dot_dimension_numbers<[1], [0], [0], [1], [0, 0, 1, 1], [], []>} : vector<2x32xf32>, vector<32x128xf32>, vector<2x128xf32> -> vector<2x128xf32>
    %c0_17 = arith.constant 0 : index
    %c0_18 = arith.constant 0 : index
    %18 = vector.load %arg9[%c0_17, %c0_18] : memref<2x1xf32, #tpu.memory_space<vmem>>, vector<2x1xf32>
    %19 = vector.broadcast %18 : vector<2x1xf32> to vector<2x128xf32>
    %20 = arith.addf %17, %19 : vector<2x128xf32>
    %c0_19 = arith.constant 0 : index
    %c0_20 = arith.constant 0 : index
    %21 = vector.load %arg6[%c0_19, %c0_20] : memref<2x32xf32, #tpu.memory_space<vmem>>, vector<2x32xf32>
    %cst_21 = arith.constant dense<0.000000e+00> : vector<2x128xf32>
    %22 = tpu.matmul %21, %15, %cst_21 {dimension_numbers = #tpu.dot_dimension_numbers<[1], [0], [0], [1], [0, 0, 1, 1], [], []>} : vector<2x32xf32>, vector<32x128xf32>, vector<2x128xf32> -> vector<2x128xf32>
    %c0_22 = arith.constant 0 : index
    %c0_23 = arith.constant 0 : index
    %23 = vector.load %arg10[%c0_22, %c0_23] : memref<2x1xf32, #tpu.memory_space<vmem>>, vector<2x1xf32>
    %24 = vector.broadcast %23 : vector<2x1xf32> to vector<2x128xf32>
    %25 = arith.addf %22, %24 : vector<2x128xf32>
    %cst_24 = arith.constant 4.000000e+00 : f32
    %26 = vector.broadcast %cst_24 : f32 to vector<2x128xf32>
    %27 = arith.subf %26, %25 : vector<2x128xf32>
    %cst_25 = arith.constant 0.000000e+00 : f32
    %28 = vector.broadcast %cst_25 : f32 to vector<2x128xf32>
    %29 = arith.maximumf %27, %28 : vector<2x128xf32>
    %30 = vector.broadcast %cst_25 : f32 to vector<2x128xf32>
    %31 = arith.subf %27, %30 : vector<2x128xf32>
    %32 = arith.cmpf one, %31, %31 : vector<2x128xf32>
    %33 = vector.broadcast %cst_25 : f32 to vector<2x128xf32>
    %34 = arith.addf %27, %33 : vector<2x128xf32>
    %35 = math.absf %31 : vector<2x128xf32>
    %cst_26 = arith.constant 0.000000e+00 : f32
    %36 = vector.broadcast %cst_26 : f32 to vector<2x128xf32>
    %37 = arith.subf %36, %35 : vector<2x128xf32>
    %38 = math.exp %37 : vector<2x128xf32>
    %39 = math.log1p %38 : vector<2x128xf32>
    %40 = arith.addf %29, %39 : vector<2x128xf32>
    %41 = arith.select %32, %34, %40 : vector<2x128xi1>, vector<2x128xf32>
    %cst_27 = arith.constant 4.000000e+00 : f32
    %42 = vector.broadcast %cst_27 : f32 to vector<2x128xf32>
    %43 = arith.subf %42, %41 : vector<2x128xf32>
    %cst_28 = arith.constant -4.000000e+01 : f32
    %44 = vector.broadcast %cst_28 : f32 to vector<2x128xf32>
    %45 = arith.subf %43, %44 : vector<2x128xf32>
    %cst_29 = arith.constant 0.000000e+00 : f32
    %46 = vector.broadcast %cst_29 : f32 to vector<2x128xf32>
    %47 = arith.maximumf %45, %46 : vector<2x128xf32>
    %48 = vector.broadcast %cst_29 : f32 to vector<2x128xf32>
    %49 = arith.subf %45, %48 : vector<2x128xf32>
    %50 = arith.cmpf one, %49, %49 : vector<2x128xf32>
    %51 = vector.broadcast %cst_29 : f32 to vector<2x128xf32>
    %52 = arith.addf %45, %51 : vector<2x128xf32>
    %53 = math.absf %49 : vector<2x128xf32>
    %cst_30 = arith.constant 0.000000e+00 : f32
    %54 = vector.broadcast %cst_30 : f32 to vector<2x128xf32>
    %55 = arith.subf %54, %53 : vector<2x128xf32>
    %56 = math.exp %55 : vector<2x128xf32>
    %57 = math.log1p %56 : vector<2x128xf32>
    %58 = arith.addf %47, %57 : vector<2x128xf32>
    %59 = arith.select %50, %52, %58 : vector<2x128xi1>, vector<2x128xf32>
    %cst_31 = arith.constant -4.000000e+01 : f32
    %60 = vector.broadcast %cst_31 : f32 to vector<2x128xf32>
    %61 = arith.addf %60, %59 : vector<2x128xf32>
    %cst_32 = arith.constant 5.000000e-01 : f32
    %62 = vector.broadcast %cst_32 : f32 to vector<2x128xf32>
    %63 = arith.mulf %62, %61 : vector<2x128xf32>
    %64 = math.exp %63 : vector<2x128xf32>
    %65 = arith.mulf %64, %1 : vector<2x128xf32>
    %66 = arith.addf %20, %65 : vector<2x128xf32>
    %cst_33 = arith.constant dense<0.000000e+00> : vector<128xf32>
    %67 = vector.multi_reduction <add>, %63, %cst_33 [0] : vector<2x128xf32> to vector<128xf32>
    %68 = vector.shape_cast %67 : vector<128xf32> to vector<1x128xf32>
    %69 = arith.mulf %1, %1 : vector<2x128xf32>
    %cst_34 = arith.constant dense<0.000000e+00> : vector<128xf32>
    %70 = vector.multi_reduction <add>, %69, %cst_34 [0] : vector<2x128xf32> to vector<128xf32>
    %71 = vector.shape_cast %70 : vector<128xf32> to vector<1x128xf32>
    %cst_35 = arith.constant -5.000000e-01 : f32
    %72 = vector.broadcast %cst_35 : f32 to vector<1x128xf32>
    %73 = arith.mulf %72, %71 : vector<1x128xf32>
    %74 = arith.subf %73, %68 : vector<1x128xf32>
    %cst_36 = arith.constant 1.83787704 : f32
    %75 = vector.broadcast %cst_36 : f32 to vector<1x128xf32>
    %76 = arith.subf %74, %75 : vector<1x128xf32>
    %cst_37 = arith.constant 2.83787704 : f32
    %77 = vector.broadcast %cst_37 : f32 to vector<1x128xf32>
    %78 = arith.addf %77, %68 : vector<1x128xf32>
    %c0_38 = arith.constant 0 : index
    %c0_39 = arith.constant 0 : index
    %79 = vector.load %arg11[%c0_38, %c0_39] : memref<4x128xf32, #tpu.memory_space<vmem>>, vector<2x128xf32>
    tpu.vector_store %arg11[%c0_38, %c0_39], %66 {strides = array<i32>} : memref<4x128xf32, #tpu.memory_space<vmem>>, vector<2x128xf32>,
    %c2 = arith.constant 2 : index
    %c0_40 = arith.constant 0 : index
    %80 = vector.load %arg11[%c2, %c0_40] : memref<4x128xf32, #tpu.memory_space<vmem>>, vector<1x128xf32>
    tpu.vector_store %arg11[%c2, %c0_40], %76 {strides = array<i32>} : memref<4x128xf32, #tpu.memory_space<vmem>>, vector<1x128xf32>,
    %c3 = arith.constant 3 : index
    %c0_41 = arith.constant 0 : index
    %81 = vector.load %arg11[%c3, %c0_41] : memref<4x128xf32, #tpu.memory_space<vmem>>, vector<1x128xf32>
    tpu.vector_store %arg11[%c3, %c0_41], %78 {strides = array<i32>} : memref<4x128xf32, #tpu.memory_space<vmem>>, vector<1x128xf32>,
    return
  }
  func.func @transform_0(%arg0: i32) -> (i32, i32) {
    %c0_i32 = arith.constant 0 : i32
    %c0_i32_0 = arith.constant 0 : i32
    return %c0_i32, %arg0 : i32, i32
  }
  func.func @transform_1(%arg0: i32) -> (i32, i32) {
    %c0_i32 = arith.constant 0 : i32
    %c0_i32_0 = arith.constant 0 : i32
    return %c0_i32, %arg0 : i32, i32
  }
  func.func @transform_2(%arg0: i32) -> (i32, i32) {
    %c0_i32 = arith.constant 0 : i32
    %c0_i32_0 = arith.constant 0 : i32
    %c0_i32_1 = arith.constant 0 : i32
    return %c0_i32, %c0_i32_0 : i32, i32
  }
  func.func @transform_3(%arg0: i32) -> (i32, i32) {
    %c0_i32 = arith.constant 0 : i32
    %c0_i32_0 = arith.constant 0 : i32
    %c0_i32_1 = arith.constant 0 : i32
    return %c0_i32, %c0_i32_0 : i32, i32
  }
  func.func @transform_4(%arg0: i32) -> (i32, i32) {
    %c0_i32 = arith.constant 0 : i32
    %c0_i32_0 = arith.constant 0 : i32
    %c0_i32_1 = arith.constant 0 : i32
    return %c0_i32, %c0_i32_0 : i32, i32
  }
  func.func @transform_5(%arg0: i32) -> (i32, i32) {
    %c0_i32 = arith.constant 0 : i32
    %c0_i32_0 = arith.constant 0 : i32
    %c0_i32_1 = arith.constant 0 : i32
    return %c0_i32, %c0_i32_0 : i32, i32
  }
  func.func @transform_6(%arg0: i32) -> (i32, i32) {
    %c0_i32 = arith.constant 0 : i32
    %c0_i32_0 = arith.constant 0 : i32
    %c0_i32_1 = arith.constant 0 : i32
    return %c0_i32, %c0_i32_0 : i32, i32
  }
  func.func @transform_7(%arg0: i32) -> (i32, i32) {
    %c0_i32 = arith.constant 0 : i32
    %c0_i32_0 = arith.constant 0 : i32
    %c0_i32_1 = arith.constant 0 : i32
    return %c0_i32, %c0_i32_0 : i32, i32
  }
  func.func @transform_8(%arg0: i32) -> (i32, i32) {
    %c0_i32 = arith.constant 0 : i32
    %c0_i32_0 = arith.constant 0 : i32
    %c0_i32_1 = arith.constant 0 : i32
    return %c0_i32, %c0_i32_0 : i32, i32
  }
  func.func @transform_9(%arg0: i32) -> (i32, i32) {
    %c0_i32 = arith.constant 0 : i32
    %c0_i32_0 = arith.constant 0 : i32
    %c0_i32_1 = arith.constant 0 : i32
    return %c0_i32, %c0_i32_0 : i32, i32
  }
  func.func @transform_10(%arg0: i32) -> (i32, i32) {
    %c0_i32 = arith.constant 0 : i32
    %c0_i32_0 = arith.constant 0 : i32
    return %c0_i32, %arg0 : i32, i32
  }
}

</mosaic_0001>

<bundles_post_ra>
// kernel: tpu_custom_call.1
= control target key start
LH: loop header
LB: loop body
LE: loop exit
PB: predicated region body
PF: predicated region fallthrough
CT: control target
= control target key end

     0   :  { %vm79_vm0 = vcmask 1043456   ;;  %vm66_vm1 = vcmask 31744   ;;  %v685_v5 = vmov 0   ;;  %s838_s0 = inlined_call_operand.vmem [shape: f32[4,128], index: 0, kind: input, shape index: {}]   ;;  %s839_s1 = inlined_call_operand.vmem [shape: f32[2,128], index: 1, kind: input, shape index: {}]   ;;  %s840_s2 = inlined_call_operand.vmem [shape: f32[32,4], index: 2, kind: input, shape index: {}]   ;;  %s841_s3 = inlined_call_operand.vmem [shape: f32[32,32], index: 3, kind: input, shape index: {}]   ;;  %s842_s4 = inlined_call_operand.vmem [shape: f32[2,32], index: 4, kind: input, shape index: {}]   ;;  %s843_s5 = inlined_call_operand.vmem [shape: f32[2,32], index: 5, kind: input, shape index: {}]   ;;  %s844_s6 = inlined_call_operand.vmem [shape: f32[32,1], index: 6, kind: input, shape index: {}]   ;;  %s845_s7 = inlined_call_operand.vmem [shape: f32[32,1], index: 7, kind: input, shape index: {}]   ;;  %s846_s8 = inlined_call_operand.vmem [shape: f32[2,1], index: 8, kind: input, shape index: {}]   ;;  %s847_s9 = inlined_call_operand.vmem [shape: f32[2,1], index: 9, kind: input, shape index: {}]   ;;  %s848_s10 = inlined_call_operand.hbm [shape: f32[4,128], index: 10, kind: output, shape index: {}]  }
   0x1   :  { %v36_v0 = vld [vmem:[%s838_s0] sm:$0xf]  ;;  %v39_v2 = vld [vmem:[%s840_s2 + $0x8] sm:$0xff]  ;;  %v40_v3 = vld [vmem:[%s840_s2 + $0x10] sm:$0xff]  ;;  %649 = vset.pattern.permute.xlu0 %v685_v5  ;;  %650 = vset.pattern.permute.xlu1 %v685_v5 }
   0x2   :  { %v38_v1 = vld [vmem:[%s840_s2] sm:$0xff]  ;;  %580 = vmatprep.subr.msk.mxu0 %vm79_vm0, %v36_v0  ;;  %v44_v6 = vld [vmem:[%s844_s6 + $0x10] sm:$0xff]  ;;  %v41_v7 = vld [vmem:[%s840_s2 + $0x18] sm:$0xff] }
   0x3   :  { %582 = vmatprep.mubr.msk.f32.mxu0 %vm66_vm1, %v38_v1  ;;  %v42_v4 = vld [vmem:[%s844_s6] sm:$0xff]  ;;  %581 = vmatpush3.msk.msra.mxu0 %vm79_vm0, %v36_v0  ;;  %v43_v8 = vld [vmem:[%s844_s6 + $0x8] sm:$0xff] }
   0x4   :  { %583 = vmatmul.mubr.msk.f32.vlgmr.msra.gmra.mrb[0].mxu0 %vm66_vm1, %v39_v2  ;;  %48 = vperm.xlu0 %649, %v42_v4  }
   0x5   :  { %585 = vmatprep.mubr.msk.f32.mxu0 %vm66_vm1, %v40_v3  ;;  %58 = vperm.xlu1 %650, %v44_v6  }
   0x6   :  { %15 = vsyncpa [#allocation3], 0  ;;  %v45_v9 = vld [vmem:[%s844_s6 + $0x18] sm:$0xff]  ;;  %v176_v10 = vld [vmem:[%s845_s7] sm:$0xff]  ;;  %vm200_vm2 = vcmask 261120   ;;  %v686_v38 = vmov 0.0|0.0  }
   0x7   :  { %v177_v11 = vld [vmem:[%s845_s7 + $0x8] sm:$0xff]  ;;  %v178_v12 = vld [vmem:[%s845_s7 + $0x10] sm:$0xff]  ;;  %v179_v13 = vld [vmem:[%s845_s7 + $0x18] sm:$0xff]  ;;  %632 = vmatprep.subr.bf16.mxu0 %v686_v38  ;;  %vm687_vm3 = vmmov 0   ;;  %v688_v39 = vmov 0.0   ;;  %vm507_vm6 = vcmask 1041408  }
   0x8   :  { %586 = vmatmul.mubr.msk.f32.gmra.mrb[2].mxu0 %vm66_vm1, %v41_v7  ;;  %53 = vperm.xlu0 %649, %v43_v8   ;;  %v383_v14 = vld [vmem:[%s847_s9] sm:$0x3]  ;;  %v173_v35 = vld [vmem:[%s841_s3 + $0x8] sm:$0xff]  ;;  %v174_v36 = vld [vmem:[%s841_s3 + $0x10] sm:$0xff] }
   0x9   :  { %63 = vperm.xlu1 %650, %v45_v9   ;;  %v303_v15 = vld [vmem:[%s846_s8] sm:$0x3]  ;;  %v175_v37 = vld [vmem:[%s841_s3 + $0x18] sm:$0xff]  ;;  %610 = vmatprep.mubr.msk.f32.mxu0 %vm687_vm3, %v688_v39 }
   0xa   :  { %v172_v16 = vld [vmem:[%s841_s3] sm:$0xff] }
   0xb   :  { %596 = vmatprep.mubr.msk.f32.mxu1 %vm200_vm2, %v172_v16  ;;  %v302_v58 = vld [vmem:[%s842_s4] sm:$0x3] }
   0xc   :  { %182 = vperm.xlu0 %649, %v176_v10   ;;  %v382_v59 = vld [vmem:[%s843_s5] sm:$0x3] }
   0xd   :  { %187 = vperm.xlu1 %650, %v177_v11  }
  0x10   :  { %192 = vperm.xlu0 %649, %v178_v12  }
  0x11   :  { %197 = vperm.xlu1 %650, %v179_v13  }
  0x14   :  { %386 = vperm.xlu0 %649, %v383_v14  }
  0x15   :  { %306 = vperm.xlu1 %650, %v303_v15  }
  0x83   :  { %v49_v17 = vpop.permute.xlu0 %48 }
  0x84   :  { %v59_v18 = vpop.permute.xlu1 %58 }
  0x87   :  { %v54_v19 = vpop.permute.xlu0 %53 }
  0x88   :  { %v64_v25 = vpop.permute.xlu1 %63 }
  0x8b   :  { %v183_v41 = vpop.permute.xlu0 %182 }
  0x8c   :  { %v188_v40 = vpop.permute.xlu1 %187 }
  0x8f   :  { %v193_v50 = vpop.permute.xlu0 %192 }
  0x90   :  { %v198_v47 = vpop.permute.xlu1 %197 }
  0x93   :  { %v387_v60 = vpop.permute.xlu0 %386 }
  0xd7   :  { %v584_v20 = vpop.f32.mrb[0].mxu0 }
  0xd8   :  { %v155_v21 = vadd.f32 %v584_v20, %v54_v19  ;;  %v149_v22 = vpop.f32.mrb[1].mxu0 }
  0xd9   :  { %v150_v23 = vadd.f32 %v149_v22, %v49_v17 }
  0xda   :  { %v169_v24 = vmax.f32 %v155_v21, 0.0 }
  0xdb   :  { %v168_v26 = vmax.f32 %v150_v23, 0.0  ;;  %v587_v27 = vpop.f32.mrb[2].mxu0  ;;  %v37_v23 = vld [vmem:[%s839_s1] sm:$0x3]  ;;  %s689_s1 = smov [#allocation2]  }
  0xdc   :  { %v165_v28 = vadd.f32 %v587_v27, %v64_v25  ;;  %v159_v29 = vpop.f32.mrb[3].mxu0  ;;  %s536_s27 = sshll.u32 %s689_s1, 4  ;;  %s537_s27 = int_to_ptr.vmem [resolvable:$true] %s536_s27 }
  0xdd   :  { %v160_v30 = vadd.f32 %v159_v29, %v59_v18  ;;  %v624_v31 = vpack.c.bf16 %v169_v24, %v168_v26  ;;  %v515_v26 = vmul.f32 %v37_v23, %v37_v23  ;;  %s661_s28 = scalar_lea.vmem %s537_s27, 64  ;;  %p666_p1 = scmp.lt.s32.totalorder %s537_s27, %s537_s27 }
  0xde   :  { %v171_v32 = vmax.f32 %v165_v28, 0.0  ;;  %p662_p0 = scmp.ne.s32.totalorder %s537_s27, %s661_s28  ;;  %p667_p2 = scmp.lt.s32.totalorder %s661_s28, %s661_s28 }
  0xdf   :  { %v170_v33 = vmax.f32 %v160_v30, 0.0  ;;  %625 = vmatprep.subr.bf16.mxu1 %v624_v31  ;;  %v516_v28 = vsel %vm507_vm6, %v515_v26, 0.0 }
  0xe0   :  { %627 = vmatpush3.bf16.msra.mxu1 %v624_v31  ;;  %v517_v29 = vrot.slane %v516_v28, 4  ;;  %p668_p3 = por %p667_p2, %p666_p1 }
  0xe1   :  { %v628_v34 = vpack.c.bf16 %v171_v32, %v170_v33 }
  0xe2   :  { %v518_v33 = vadd.f32 %v517_v29, %v516_v28  ;;  %p669_p4 = pnand %p668_p3, %p662_p0 }
  0xe3   :  { %629 = vmatprep.subr.bf16.mxu1 %v628_v34 }
  0xe4   :  { %631 = vmatpush3.bf16.msra.mxu1 %v628_v34 }
  0xe5   :  { %638 = vmatprep.subr.bf16.mxu1 %v686_v38 }
  0xe7   :  { %597 = vmatmul.mubr.msk.f32.vlgmr.msra.gmra.mrb[0].mxu1 %vm200_vm2, %v173_v35 }
  0xe8   :  { %599 = vmatprep.mubr.msk.f32.mxu1 %vm200_vm2, %v174_v36 }
  0xeb   :  { %600 = vmatmul.mubr.msk.f32.gmra.mrb[2].mxu1 %vm200_vm2, %v175_v37 }
  0xec   :  { %621 = vmatprep.mubr.msk.f32.mxu1 %vm687_vm3, %v688_v39  ;;  %v519_v39 = vrot.slane %v518_v33, 2 }
 0x1ba   :  { %v598_v42 = vpop.f32.mrb[0].mxu1 }
 0x1bb   :  { %v285_v43 = vadd.f32 %v598_v42, %v188_v40  ;;  %v279_v44 = vpop.f32.mrb[1].mxu1  ;;  %v520_v42 = vadd.f32 %v519_v39, %v518_v33 }
 0x1bc   :  { %v280_v45 = vadd.f32 %v279_v44, %v183_v41 }
 0x1bd   :  { %v299_v46 = vmax.f32 %v285_v43, 0.0 }
 0x1be   :  { %v298_v48 = vmax.f32 %v280_v45, 0.0  ;;  %v601_v49 = vpop.f32.mrb[2].mxu1 }
 0x1bf   :  { %v295_v51 = vadd.f32 %v601_v49, %v198_v47  ;;  %v289_v52 = vpop.f32.mrb[3].mxu1  ;;  %v521_v47 = vrot.slane %v520_v42, 1 }
 0x1c0   :  { %v633_v53 = vpack.c.bf16 %v299_v46, %v298_v48  ;;  %v290_v54 = vadd.f32 %v289_v52, %v193_v50 }
 0x1c1   :  { %v301_v55 = vmax.f32 %v295_v51, 0.0  ;;  %v522_v50 = vadd.f32 %v521_v47, %v520_v42 }
 0x1c2   :  { %v300_v56 = vmax.f32 %v290_v54, 0.0  ;;  %634 = vmatpush3.bf16.msra.mxu0 %v633_v53  ;;  %640 = vmatpush3.bf16.msra.mxu1 %v633_v53 }
 0x1c3   :  { %635 = vmatprep.subr.bf16.mxu0 %v686_v38  ;;  %641 = vmatprep.subr.bf16.mxu1 %v686_v38  ;;  %v523_v53 = vmul.f32 -0.5, %v522_v50 }
 0x1c4   :  { %v636_v57 = vpack.c.bf16 %v301_v55, %v300_v56  ;;  %v307_v56 = vpop.permute.xlu1 %306 }
 0x1c6   :  { %637 = vmatpush3.bf16.msra.mxu0 %v636_v57  ;;  %643 = vmatpush3.bf16.msra.mxu1 %v636_v57 }
 0x1c9   :  { %611 = vmatmul.mubr.msk.f32.vlgmr.msra.gmra.mrb[4].mxu0 %vm200_vm2, %v302_v58  ;;  %622 = vmatmul.mubr.msk.f32.vlgmr.msra.gmra.mrb[4].mxu1 %vm200_vm2, %v382_v59 }
 0x29c   :  { %v818_v61 = vpop.f32.mrb[4].mxu0  ;;  %v458_v62 = vpop.f32.mrb[4].mxu1 }
 0x29d   :  { %v459_v63 = vadd.f32 %v458_v62, %v387_v60  ;;  %v623_v0 = vpop.f32.mrb[5].mxu1  ;;  %v612_v1 = vpop.f32.mrb[5].mxu0  ;;  %v379_v57 = vadd.f32 %v818_v61, %v307_v56 }
 0x29f   :  { %v462_v2 = vsub.f32 4.0, %v459_v63 }
 0x2a1   :  { %v466_v3 = vand.u32 2147483647, %v462_v2  ;;  %v463_v14 = vmax.f32 %v462_v2, 0.0  ;;  %vm464_vm5 = vcmp.ne.f32.partialorder %v462_v2, %v462_v2 }
 0x2a3   :  { %v467_v4 = vsub.f32 0.0, %v466_v3 }
 0x2a5   :  { %v468_v5 = vmul.f32 1.442695, %v467_v4 }
 0x2a7   :  { %651 = vpow2.f32 %v468_v5 }
 0x2b1   :  { %v652_v6 = vpop.eup %651 }
 0x2b2   :  { %v470_v7 = vadd.f32 1.0, %v652_v6  ;;  %v473_v8 = vmul.f32 -0.5, %v652_v6  ;;  %v476_v10 = vand.u32 2147483647, %v652_v6 }
 0x2b4   :  { %653 = vlog2.f32 %v470_v7  ;;  %v474_v9 = vadd.f32 1.0, %v473_v8  ;;  %vm477_vm4 = vcmp.lt.f32.partialorder %v476_v10, 0.0004427343 }
 0x2b6   :  { %v475_v13 = vmul.f32 %v652_v6, %v474_v9 }
 0x2be   :  { %v654_v11 = vpop.eup %653 }
 0x2bf   :  { %v472_v12 = vmul.f32 0.6931472, %v654_v11 }
 0x2c1   :  { %v478_v15 = vsel %vm477_vm4, %v475_v13, %v472_v12 }
 0x2c2   :  { %v479_v16 = vadd.f32 %v478_v15, %v463_v14 }
 0x2c4   :  { %v480_v17 = vsel %vm464_vm5, %v462_v2, %v479_v16 }
 0x2c5   :  { %v481_v18 = vsub.f32 4.0, %v480_v17 }
 0x2c7   :  { %v555_v19 = vadd.f32 40.0, %v481_v18 }
 0x2c9   :  { %v486_v20 = vand.u32 2147483647, %v555_v19  ;;  %v483_v36 = vmax.f32 %v555_v19, 0.0  ;;  %vm484_vm8 = vcmp.ne.f32.partialorder %v555_v19, %v555_v19 }
 0x2cb   :  { %v487_v21 = vsub.f32 0.0, %v486_v20 }
 0x2cd   :  { %v488_v22 = vmul.f32 1.442695, %v487_v21 }
 0x2cf   :  { %655 = vpow2.f32 %v488_v22 }
 0x2d9   :  { %v656_v24 = vpop.eup %655 }
 0x2da   :  { %v490_v25 = vadd.f32 1.0, %v656_v24  ;;  %v493_v27 = vmul.f32 -0.5, %v656_v24  ;;  %v496_v31 = vand.u32 2147483647, %v656_v24 }
 0x2dc   :  { %657 = vlog2.f32 %v490_v25  ;;  %v494_v30 = vadd.f32 1.0, %v493_v27  ;;  %vm497_vm7 = vcmp.lt.f32.partialorder %v496_v31, 0.0004427343 }
 0x2de   :  { %v495_v35 = vmul.f32 %v656_v24, %v494_v30 }
 0x2e6   :  { %v658_v32 = vpop.eup %657 }
 0x2e7   :  { %v492_v34 = vmul.f32 0.6931472, %v658_v32 }
 0x2e9   :  { %v498_v37 = vsel %vm497_vm7, %v495_v35, %v492_v34 }
 0x2ea   :  { %v499_v38 = vadd.f32 %v498_v37, %v483_v36 }
 0x2ec   :  { %v500_v40 = vsel %vm484_vm8, %v555_v19, %v499_v38 }
 0x2ed   :  { %v501_v41 = vadd.f32 -40.0, %v500_v40 }
 0x2ef   :  { %v502_v43 = vmul.f32 0.5, %v501_v41 }
 0x2f1   :  { %v503_v44 = vmul.f32 1.442695, %v502_v43  ;;  %v508_v45 = vsel %vm507_vm6, %v502_v43, 0.0 }
 0x2f2   :  { %v509_v46 = vrot.slane %v508_v45, 4 }
 0x2f3   :  { %659 = vpow2.f32 %v503_v44 }
 0x2f4   :  { %v510_v48 = vadd.f32 %v509_v46, %v508_v45 }
 0x2f6   :  { %v511_v49 = vrot.slane %v510_v48, 2 }
 0x2f8   :  { %v512_v51 = vadd.f32 %v511_v49, %v510_v48 }
 0x2fa   :  { %v513_v52 = vrot.slane %v512_v51, 1 }
 0x2fc   :  { %v514_v54 = vadd.f32 %v513_v52, %v512_v51 }
 0x2fd   :  { %v660_v55 = vpop.eup %659 }
 0x2fe   :  { %v505_v58 = vmul.f32 %v660_v55, %v37_v23  ;;  %v524_v59 = vsub.f32 %v523_v53, %v514_v54  ;;  %v526_v60 = vadd.f32 2.837877, %v514_v54 }
 0x300   :  { %v506_v62 = vadd.f32 %v505_v58, %v379_v57  ;;  %v556_v63 = vadd.f32 -1.837877, %v524_v59  ;;  %529 = vst [vmem:[#allocation2 + $0x3] sm:$0x1] %v526_v60 }
 0x302   :  { %527 = vst [vmem:[#allocation2] sm:$0x3] %v506_v62  ;;  %528 = vst [vmem:[#allocation2 + $0x2] sm:$0x1] %v556_v63 }
 0x303   :  { %672 = shalt.err (!%p669_p4)
}
 0x304   :  { %s673_s11 = scalar_lea.hbm %s848_s10, 64 }
 0x305   :  { %p674_p5 = scmp.ne.s32.totalorder %s848_s10, %s673_s11  ;;  %p677_p6 = scmp.lt.u32.totalorder %s673_s11, %s848_s10 }
 0x307   :  { %p679_p7 = pnand %p677_p6, %p674_p5 }
 0x309   :  { %682 = shalt.err (!%p679_p7)
}
 0x30a   :  { %539 = dma.vmem_to_hbm [thread:$0]  %s537_s27, 64, %s848_s10, [#allocation3]  }
 0x30b   :  { %683 = dma.done.wait [#allocation3], 64  }
 0x30c   :  { %684 = vsyncadd [#allocation3], 4294967232 }
 0x30d   :  { %543 = vsyncpa [#allocation3], 1 }

</bundles_post_ra>
